<compile_context>
chip_gen: v7x
topology: tpu7x:2x2x1
jax: 0.10.0
libtpu: 0.0.40
codegen_flags: <defaults>
</compile_context>

<pallas_src>
import functools

import jax
import jax.numpy as jnp
from jax.experimental import pallas as pl
from jax.experimental.pallas import tpu as pltpu

LANE = 128


def _round_up(v, m):
    return ((v + m - 1) // m) * m


def _vmem_capacity_bytes():
    try:
        cap = getattr(pltpu.get_tpu_info(), "vmem_capacity_bytes", None)
        if cap:
            return int(cap)
    except Exception:
        pass
    return 64 << 20  # conservative default (v7x per-core VMEM)


def _pad2(a, rows, cols, dtype):
    """Cast + zero-pad a 2-D array; skips the extra copy when already correct."""
    a = a.astype(dtype)
    if a.shape == (rows, cols):
        return a
    return jnp.zeros((rows, cols), dtype).at[: a.shape[0], : a.shape[1]].set(a)


def gcn_encoder(x, adj, params, *, compute_dtype=jnp.bfloat16, adj_resident=None):
    """relu(adj @ relu(adj @ x @ W1 + b1) @ W2 + b2) as one fused Pallas call."""
    (w1, b1), (w2, b2) = params
    n, f_in = x.shape
    hidden = w1.shape[1]
    f_out = w2.shape[1]
    assert adj.shape == (n, n)
    assert w1.shape == (f_in, hidden) and b1.shape == (hidden,)
    assert w2.shape == (hidden, f_out) and b2.shape == (f_out,)

    cdt = jnp.dtype(compute_dtype)
    itemsize = cdt.itemsize
    hid_p = _round_up(hidden, LANE)
    fout_p = _round_up(f_out, LANE)
    n8 = _round_up(n, 8)

    # ~96 MiB usable on v5e/v6e (128 MiB VMEM), ~48 MiB on v7x (64 MiB VMEM).
    budget = (_vmem_capacity_bytes() * 3) // 4

    def vmem_bytes(tm_, n_pad_, adj_res):
        adj_b = (n_pad_ * n_pad_ if adj_res else 2 * tm_ * n_pad_) * itemsize
        xw1_b = n_pad_ * hid_p * itemsize          # single-buffered (Buffered(1))
        w2_b = hid_p * fout_p * itemsize           # single-buffered
        bias_b = (hid_p + fout_p) * 4              # single-buffered
        out_b = 2 * tm_ * fout_p * 4               # double-buffered output
        hw2_b = n_pad_ * fout_p * itemsize         # resident scratch
        tmp_b = 2 * tm_ * (hid_p + fout_p) * 4     # f32 agg / h / out temporaries
        return adj_b + xw1_b + w2_b + bias_b + out_b + hw2_b + tmp_b

    # bf16 packs 16 rows per vreg -> keep the row tile 16-aligned when possible (v5e).
    min_tile = 16 if (itemsize == 2 and n8 % 16 == 0) else 8

    def pick_tiling(adj_res):
        cands = [c for c in (1024, 512, 256, 128, 64, 32, 16, 8)
                 if c <= n8 and c % min_tile == 0]
        if not cands:
            cands = [min(min_tile, n8)]
        for cand in cands:
            np_c = _round_up(n8, cand)
            if np_c - n8 > max(64, n8 // 8):       # cap adj row-padding waste
                continue
            if vmem_bytes(cand, np_c, adj_res) <= budget:
                return cand, np_c, True
        cand = cands[-1]
        np_c = _round_up(n8, cand)
        return cand, np_c, vmem_bytes(cand, np_c, adj_res) <= budget

    if adj_resident is None:
        # Resident adj is DMA'd once instead of once per phase -> half the HBM traffic.
        adj_resident = pick_tiling(True)[2]
    tm, n_pad, _ = pick_tiling(adj_resident)
    num_tiles = n_pad // tm

    # Layer-1 reassociation: xw1 = x @ W1 computed once (f32); b1 is added only after
    # the adj contraction inside the kernel, so padded xw1 rows stay exactly zero.
    xw1 = x.astype(jnp.float32) @ w1.astype(jnp.float32)

    adj_p = _pad2(adj, n_pad, n_pad, cdt)          # zero cols annihilate padded rows
    xw1_p = _pad2(xw1, n_pad, hid_p, cdt)
    w2_p = _pad2(w2, hid_p, fout_p, cdt)
    b1_p = _pad2(b1.reshape(1, -1), 1, hid_p, jnp.float32)
    b2_p = _pad2(b2.reshape(1, -1), 1, fout_p, jnp.float32)

    def kernel(adj_ref, xw1_ref, b1_ref, w2_ref, b2_ref, out_ref, hw2_ref):
        phase = pl.program_id(0)
        tile = pl.program_id(1)
        row0 = pl.multiple_of(tile * tm, tm)
        if adj_resident:
            adj_rows = adj_ref[pl.ds(row0, tm), :]     # slice the resident block
        else:
            adj_rows = adj_ref[...]                    # streamed row tile

        # Robustness: never let an uninitialized output buffer be written back.
        @pl.when(jnp.logical_and(phase == 0, tile == 0))
        def _init_out():
            out_ref[...] = jnp.zeros_like(out_ref)

        @pl.when(phase == 0)
        def _layer1():
            agg = jnp.dot(adj_rows, xw1_ref[...],
                          preferred_element_type=jnp.float32)
            h = jnp.maximum(agg + b1_ref[...], 0.0)
            hw2 = jnp.dot(h.astype(w2_ref.dtype), w2_ref[...],
                          preferred_element_type=jnp.float32)
            hw2_ref[pl.ds(row0, tm), :] = hw2.astype(hw2_ref.dtype)

        @pl.when(phase == 1)
        def _layer2():
            agg = jnp.dot(adj_rows, hw2_ref[...],
                          preferred_element_type=jnp.float32)
            out_ref[...] = jnp.maximum(agg + b2_ref[...], 0.0).astype(out_ref.dtype)

    single = pl.Buffered(1)   # constant-index operands: fetched once, one buffer
    if adj_resident:
        adj_spec = pl.BlockSpec((n_pad, n_pad), lambda p, i: (0, 0),
                                pipeline_mode=single)
    else:
        adj_spec = pl.BlockSpec((tm, n_pad), lambda p, i: (i, 0))

    in_specs = [
        adj_spec,
        pl.BlockSpec((n_pad, hid_p), lambda p, i: (0, 0), pipeline_mode=single),
        pl.BlockSpec((1, hid_p), lambda p, i: (0, 0), pipeline_mode=single),
        pl.BlockSpec((hid_p, fout_p), lambda p, i: (0, 0), pipeline_mode=single),
        pl.BlockSpec((1, fout_p), lambda p, i: (0, 0), pipeline_mode=single),
    ]
    # Output is only written in phase 1; (i * p) pins block 0 during phase 0 so the
    # zero-initialized buffer is the only thing that could ever be written back early.
    out_spec = pl.BlockSpec((tm, fout_p), lambda p, i: (i * p, 0))

    est = vmem_bytes(tm, n_pad, adj_resident)
    vmem_limit = int(max(min(max(2 * est, 32 << 20), budget), est + (4 << 20)))

    flops = (2 * n_pad * n_pad * (hid_p + fout_p)      # adj@xw1 + adj@hw2
             + 2 * n_pad * hid_p * fout_p)             # h@W2
    adj_reads = 1 if adj_resident else 2
    bytes_accessed = (adj_reads * n_pad * n_pad * itemsize
                      + (n_pad * hid_p + hid_p * fout_p) * itemsize
                      + (hid_p + fout_p) * 4 + n_pad * fout_p * 4)

    out_padded = pl.pallas_call(
        kernel,
        out_shape=jax.ShapeDtypeStruct((n_pad, fout_p), jnp.float32),
        grid_spec=pltpu.PrefetchScalarGridSpec(
            num_scalar_prefetch=0,
            grid=(2, num_tiles),
            in_specs=in_specs,
            out_specs=out_spec,
            scratch_shapes=[pltpu.VMEM((n_pad, fout_p), cdt)],
        ),
        compiler_params=pltpu.CompilerParams(
            # phase 1 reads the scratch written by phase 0 -> sequential grid.
            dimension_semantics=("arbitrary", "arbitrary"),
            vmem_limit_bytes=vmem_limit,
        ),
        cost_estimate=pl.CostEstimate(flops=int(flops), transcendentals=0,
                                      bytes_accessed=int(bytes_accessed)),
    )(adj_p, xw1_p, b1_p, w2_p, b2_p)

    return out_padded[:n, :f_out]


def init_linear(key, in_feats, out_feats):
    # Mimics nn.Linear's uniform(-1/sqrt(in), 1/sqrt(in)); stored as [in, out]
    # so the forward pass is h @ W (== PyTorch h @ W.T with W [out, in]).
    kw, kb = jax.random.split(key)
    bound = 1.0 / jnp.sqrt(jnp.float32(in_feats))
    w = jax.random.uniform(kw, (in_feats, out_feats), jnp.float32, -bound, bound)
    b = jax.random.uniform(kb, (out_feats,), jnp.float32, -bound, bound)
    return w, b


def reference_gcn(x, adj, params):
    (w1, b1), (w2, b2) = params
    h = jnp.maximum(adj @ x @ w1 + b1, 0.0)
    return jnp.maximum(adj @ h @ w2 + b2, 0.0)


if __name__ == "__main__":
    key = jax.random.PRNGKey(0)
    k_x, k_adj, k_l1, k_l2 = jax.random.split(key, 4)

    N = 8            # nodes
    input_dim = 16
    hidden_dim = 32
    output_dim = 16

    x = jax.random.normal(k_x, (N, input_dim), jnp.float32)
    # symmetric, row-normalized adjacency with self loops
    a = jax.random.uniform(k_adj, (N, N), jnp.float32)
    adj = (a + a.T) * 0.5 + jnp.eye(N, dtype=jnp.float32)
    adj = adj / jnp.sum(adj, axis=-1, keepdims=True)

    params = (
        init_linear(k_l1, input_dim, hidden_dim),
        init_linear(k_l2, hidden_dim, output_dim),
    )

    ref = reference_gcn(x, adj, params)

    # f32 path (matches the module's f32 forward; reassociation changes rounding only).
    fwd_f32 = jax.jit(functools.partial(gcn_encoder, compute_dtype=jnp.float32))
    out_f32 = jax.block_until_ready(fwd_f32(x, adj, params))
    assert out_f32.shape == (N, output_dim)
    assert jnp.allclose(out_f32, ref, atol=1e-4, rtol=1e-4)

    # Default bf16-MXU path (native on v5e/v6e/v7x; halves adj HBM bytes).
    fwd_bf16 = jax.jit(gcn_encoder)
    out_bf16 = jax.block_until_ready(fwd_bf16(x, adj, params))
    assert out_bf16.shape == (N, output_dim)
    assert jnp.allclose(out_bf16, ref, atol=3e-2, rtol=3e-2)

    # Streamed-adj path (what large graphs fall back to) — exercised for coverage.
    fwd_stream = jax.jit(functools.partial(gcn_encoder, compute_dtype=jnp.float32,
                                           adj_resident=False))
    out_stream = jax.block_until_ready(fwd_stream(x, adj, params))
    assert jnp.allclose(out_stream, ref, atol=1e-4, rtol=1e-4)

    print("KERNEL_OK")
</pallas_src>

<mosaic_0001>
module attributes {stable_mosaic.version = 11 : i64} {
  func.func @kernel(%arg0: i32, %arg1: i32, %arg2: memref<8x8xf32, #tpu.memory_space<vmem>>, %arg3: memref<8x128xf32, #tpu.memory_space<vmem>>, %arg4: memref<1x128xf32, #tpu.memory_space<vmem>>, %arg5: memref<128x128xf32, #tpu.memory_space<vmem>>, %arg6: memref<1x128xf32, #tpu.memory_space<vmem>>, %arg7: memref<8x128xf32, #tpu.memory_space<vmem>>, %arg8: memref<8x128xf32, #tpu.memory_space<vmem>>) attributes {dimension_semantics = [#tpu.dimension_semantics<arbitrary>, #tpu.dimension_semantics<arbitrary>], iteration_bounds = array<i64: 2, 1>, scalar_prefetch = 0 : i64, scratch_operands = 1 : i64, tpu.core_type = #tpu.core_type<tc>, window_params = [{pipeline_mode = #tpu.pipeline_mode<synchronous>, transform_indices = @transform_0, window_bounds = array<i64: 8, 8>}, {pipeline_mode = #tpu.pipeline_mode<synchronous>, transform_indices = @transform_1, window_bounds = array<i64: 8, 128>}, {pipeline_mode = #tpu.pipeline_mode<synchronous>, transform_indices = @transform_2, window_bounds = array<i64: 1, 128>}, {pipeline_mode = #tpu.pipeline_mode<synchronous>, transform_indices = @transform_3, window_bounds = array<i64: 128, 128>}, {pipeline_mode = #tpu.pipeline_mode<synchronous>, transform_indices = @transform_4, window_bounds = array<i64: 1, 128>}, {transform_indices = @transform_5, window_bounds = array<i64: 8, 128>}]} {
    %c8_i32 = arith.constant 8 : i32
    %0 = arith.muli %arg1, %c8_i32 : i32
    %1 = tpu.assume_multiple %0, 8 : i32
    %2 = arith.index_cast %1 : i32 to index
    %c0 = arith.constant 0 : index
    %3 = vector.load %arg2[%2, %c0] : memref<8x8xf32, #tpu.memory_space<vmem>>, vector<8x8xf32>
    %c0_i32 = arith.constant 0 : i32
    %4 = arith.cmpi eq, %arg0, %c0_i32 : i32
    %c0_i32_0 = arith.constant 0 : i32
    %5 = arith.cmpi eq, %arg1, %c0_i32_0 : i32
    %6 = arith.andi %4, %5 : i1
    %7 = arith.extui %6 : i1 to i32
    %c0_i32_1 = arith.constant 0 : i32
    %8 = arith.cmpi ne, %7, %c0_i32_1 : i32
    scf.if %8 {
      %cst = arith.constant 0.000000e+00 : f32
      %15 = vector.broadcast %cst : f32 to vector<8x128xf32>
      %c0_5 = arith.constant 0 : index
      %c0_6 = arith.constant 0 : index
      %16 = vector.load %arg7[%c0_5, %c0_6] : memref<8x128xf32, #tpu.memory_space<vmem>>, vector<8x128xf32>
      tpu.vector_store %arg7[%c0_5, %c0_6], %15 {strides = array<i32>} : memref<8x128xf32, #tpu.memory_space<vmem>>, vector<8x128xf32>,
    } else {
    }
    %c0_i32_2 = arith.constant 0 : i32
    %9 = arith.cmpi eq, %arg0, %c0_i32_2 : i32
    %10 = arith.extui %9 : i1 to i32
    %c0_i32_3 = arith.constant 0 : i32
    %11 = arith.cmpi ne, %10, %c0_i32_3 : i32
    scf.if %11 {
      %c0_5 = arith.constant 0 : index
      %c0_6 = arith.constant 0 : index
      %15 = vector.load %arg3[%c0_5, %c0_6] : memref<8x128xf32, #tpu.memory_space<vmem>>, vector<8x128xf32>
      %cst = arith.constant dense<0.000000e+00> : vector<8x128xf32>
      %16 = tpu.matmul %3, %15, %cst {dimension_numbers = #tpu.dot_dimension_numbers<[1], [0], [0], [1], [0, 0, 1, 1], [], []>} : vector<8x8xf32>, vector<8x128xf32>, vector<8x128xf32> -> vector<8x128xf32>
      %c0_7 = arith.constant 0 : index
      %c0_8 = arith.constant 0 : index
      %17 = vector.load %arg4[%c0_7, %c0_8] : memref<1x128xf32, #tpu.memory_space<vmem>>, vector<1x128xf32>
      %18 = vector.broadcast %17 : vector<1x128xf32> to vector<8x128xf32>
      %19 = arith.addf %16, %18 : vector<8x128xf32>
      %cst_9 = arith.constant 0.000000e+00 : f32
      %20 = vector.broadcast %cst_9 : f32 to vector<8x128xf32>
      %21 = arith.maximumf %19, %20 : vector<8x128xf32>
      %c0_10 = arith.constant 0 : index
      %c0_11 = arith.constant 0 : index
      %22 = vector.load %arg5[%c0_10, %c0_11] : memref<128x128xf32, #tpu.memory_space<vmem>>, vector<128x128xf32>
      %cst_12 = arith.constant dense<0.000000e+00> : vector<8x128xf32>
      %23 = tpu.matmul %21, %22, %cst_12 {dimension_numbers = #tpu.dot_dimension_numbers<[1], [0], [0], [1], [0, 0, 1, 1], [], []>} : vector<8x128xf32>, vector<128x128xf32>, vector<8x128xf32> -> vector<8x128xf32>
      %24 = arith.index_cast %1 : i32 to index
      %c0_13 = arith.constant 0 : index
      %25 = vector.load %arg8[%24, %c0_13] : memref<8x128xf32, #tpu.memory_space<vmem>>, vector<8x128xf32>
      tpu.vector_store %arg8[%24, %c0_13], %23 {strides = array<i32>} : memref<8x128xf32, #tpu.memory_space<vmem>>, vector<8x128xf32>,
    } else {
    }
    %c1_i32 = arith.constant 1 : i32
    %12 = arith.cmpi eq, %arg0, %c1_i32 : i32
    %13 = arith.extui %12 : i1 to i32
    %c0_i32_4 = arith.constant 0 : i32
    %14 = arith.cmpi ne, %13, %c0_i32_4 : i32
    scf.if %14 {
      %c0_5 = arith.constant 0 : index
      %c0_6 = arith.constant 0 : index
      %15 = vector.load %arg8[%c0_5, %c0_6] : memref<8x128xf32, #tpu.memory_space<vmem>>, vector<8x128xf32>
      %cst = arith.constant dense<0.000000e+00> : vector<8x128xf32>
      %16 = tpu.matmul %3, %15, %cst {dimension_numbers = #tpu.dot_dimension_numbers<[1], [0], [0], [1], [0, 0, 1, 1], [], []>} : vector<8x8xf32>, vector<8x128xf32>, vector<8x128xf32> -> vector<8x128xf32>
      %c0_7 = arith.constant 0 : index
      %c0_8 = arith.constant 0 : index
      %17 = vector.load %arg6[%c0_7, %c0_8] : memref<1x128xf32, #tpu.memory_space<vmem>>, vector<1x128xf32>
      %18 = vector.broadcast %17 : vector<1x128xf32> to vector<8x128xf32>
      %19 = arith.addf %16, %18 : vector<8x128xf32>
      %cst_9 = arith.constant 0.000000e+00 : f32
      %20 = vector.broadcast %cst_9 : f32 to vector<8x128xf32>
      %21 = arith.maximumf %19, %20 : vector<8x128xf32>
      %c0_10 = arith.constant 0 : index
      %c0_11 = arith.constant 0 : index
      %22 = vector.load %arg7[%c0_10, %c0_11] : memref<8x128xf32, #tpu.memory_space<vmem>>, vector<8x128xf32>
      tpu.vector_store %arg7[%c0_10, %c0_11], %21 {strides = array<i32>} : memref<8x128xf32, #tpu.memory_space<vmem>>, vector<8x128xf32>,
    } else {
    }
    return
  }
  func.func @transform_0(%arg0: i32, %arg1: i32) -> (i32, i32) {
    %c0_i32 = arith.constant 0 : i32
    %c0_i32_0 = arith.constant 0 : i32
    %c0_i32_1 = arith.constant 0 : i32
    return %c0_i32, %c0_i32_0 : i32, i32
  }
  func.func @transform_1(%arg0: i32, %arg1: i32) -> (i32, i32) {
    %c0_i32 = arith.constant 0 : i32
    %c0_i32_0 = arith.constant 0 : i32
    %c0_i32_1 = arith.constant 0 : i32
    return %c0_i32, %c0_i32_0 : i32, i32
  }
  func.func @transform_2(%arg0: i32, %arg1: i32) -> (i32, i32) {
    %c0_i32 = arith.constant 0 : i32
    %c0_i32_0 = arith.constant 0 : i32
    %c0_i32_1 = arith.constant 0 : i32
    return %c0_i32, %c0_i32_0 : i32, i32
  }
  func.func @transform_3(%arg0: i32, %arg1: i32) -> (i32, i32) {
    %c0_i32 = arith.constant 0 : i32
    %c0_i32_0 = arith.constant 0 : i32
    %c0_i32_1 = arith.constant 0 : i32
    return %c0_i32, %c0_i32_0 : i32, i32
  }
  func.func @transform_4(%arg0: i32, %arg1: i32) -> (i32, i32) {
    %c0_i32 = arith.constant 0 : i32
    %c0_i32_0 = arith.constant 0 : i32
    %c0_i32_1 = arith.constant 0 : i32
    return %c0_i32, %c0_i32_0 : i32, i32
  }
  func.func @transform_5(%arg0: i32, %arg1: i32) -> (i32, i32) {
    %0 = arith.muli %arg1, %arg0 : i32
    %c0_i32 = arith.constant 0 : i32
    %c0_i32_0 = arith.constant 0 : i32
    return %0, %c0_i32 : i32, i32
  }
}

</mosaic_0001>

<bundles_post_ra>
// kernel: gcn_encoder.1
= control target key start
LH: loop header
LB: loop body
LE: loop exit
PB: predicated region body
PF: predicated region fallthrough
CT: control target
= control target key end

     0   :  { %10 = vsyncpa [#allocation4], 0  ;;  %s928_s0 = inlined_call_operand.vmem [shape: f32[8,8], index: 0, kind: input, shape index: {}]   ;;  %s929_s1 = inlined_call_operand.vmem [shape: f32[8,128], index: 1, kind: input, shape index: {}]   ;;  %s930_s2 = inlined_call_operand.vmem [shape: f32[1,128], index: 2, kind: input, shape index: {}]   ;;  %s931_s3 = inlined_call_operand.vmem [shape: f32[128,128], index: 3, kind: input, shape index: {}]   ;;  %s932_s4 = inlined_call_operand.vmem [shape: f32[1,128], index: 4, kind: input, shape index: {}]   ;;  %s933_s5 = inlined_call_operand.hbm [shape: f32[8,128], index: 5, kind: output, shape index: {}]  }
   0x1   :  { %12 = vsyncpa [#allocation4 + $0x1], 0  ;;  %s803_s18 = smov 0   ;;  %s805_s19 = smov 0  }
   0x2   :  { %s807_s20 = smov 0  }
   0x3 LB: > { %s564_s21 = sadd.s32 4294967295, %s764_s20   ;;  %s565_s22 = sadd.s32 4294967294, %s764_s20   ;;  %s764_s20 = sphi %s807_s20, %s18_s20   ;;  %s760_s19 = sphi %s805_s19, %s936_s19   ;;  %s756_s18 = sphi %s803_s18, %s935_s18  }
   0x4   : > { %s30_s23 = sadd.s32 1, %s760_s19  ;;  %p567_p0 = scmp.ge.s32.totalorder %s764_s20, 1 }
   0x5   : > { %p32_p1 = scmp.ge.s32.totalorder %s30_s23, 2  ;;  %p194_p2 = scmp.lt.s32.totalorder %s764_s20, 3 }
   0x7   : > { %s938_s23 = smov (%p32_p1, %s30_s23), 0  ;;  %p195_p3 = pnand %p567_p0, %p194_p2 }
   0x8   : > { %v828_v0 = vld [vmem:[%s928_s0] sm:$0xff] (!%p195_p3)  ;;  %p221_p4 = scmp.eq.s32.totalorder (!%p195_p3), %s756_s18, 0 }
   0x9   : > { %198 = sbr.rel (%p195_p3) target bundleno = 704 (0x2c0), region = 40 }
  0x10   : > { %226 = sbr.rel (!%p221_p4) target bundleno = 23 (0x17), region = 44  ;;  %v766_v1 = vmov (%p221_p4), 0.0  }
  0x11   : > { %227 = vst [vmem:[#allocation3] sm:$0xff] (%p221_p4), %v766_v1 }
  0x17 PF: > { %p569_p5 = scmp.ne.s32.totalorder %s756_s18, 0 }
  0x18   : > { %v231_v2 = vld [vmem:[%s929_s1] sm:$0xff] (!%p569_p5)  ;;  %vm239_vm0 = vcmask (!%p569_p5), 64512   ;;  %v767_v4 = vmov (!%p569_p5), 0.0   ;;  %vm768_vm1 = vmmov (!%p569_p5), 0   ;;  %v315_v5 = vld [vmem:[%s931_s3 + $0x8] sm:$0xff] (!%p569_p5)  ;;  %v316_v6 = vld [vmem:[%s931_s3 + $0x10] sm:$0xff] (!%p569_p5) }
  0x19   : > { %230 = sbr.rel (%p569_p5) target bundleno = 456 (0x1c8), region = 48  ;;  %v314_v3 = vld [vmem:[%s931_s3] sm:$0xff] (!%p569_p5)  ;;  %601 = vmatprep.subr.mxu0 (!%p569_p5), %v767_v4  ;;  %603 = vmatprep.mubr.msk.f32.mxu0 (!%p569_p5), %vm768_vm1, %v767_v4  ;;  %v317_v7 = vld [vmem:[%s931_s3 + $0x18] sm:$0xff] (!%p569_p5)  ;;  %v769_v8 = vmov (!%p569_p5), 0.0|0.0   ;;  %v319_v12 = vld [vmem:[%s931_s3 + $0x28] sm:$0xff] (!%p569_p5) }
  0x1a   : > { %602 = vmatpush3.msra.mxu0 (!%p569_p5), %v231_v2  ;;  %646 = vmatprep.subr.bf16.mxu1 (!%p569_p5), %v769_v8  ;;  %v647_v9 = vpack.c.bf16 (!%p569_p5), %v315_v5, %v314_v3  ;;  %v650_v10 = vpack.c.bf16 (!%p569_p5), %v317_v7, %v316_v6  ;;  %v318_v11 = vld [vmem:[%s931_s3 + $0x20] sm:$0xff] (!%p569_p5)  ;;  %v320_v14 = vld [vmem:[%s931_s3 + $0x30] sm:$0xff] (!%p569_p5)  ;;  %v321_v15 = vld [vmem:[%s931_s3 + $0x38] sm:$0xff] (!%p569_p5) }
  0x1b   : > { %604 = vmatmul.mubr.msk.f32.vlgmr.msra.gmra.mrb[0].mxu0 (!%p569_p5), %vm239_vm0, %v828_v0  ;;  %638 = vmatprep.mubr.msk.f32.mxu1 (!%p569_p5), %vm768_vm1, %v767_v4  ;;  %v653_v13 = vpack.c.bf16 (!%p569_p5), %v319_v12, %v318_v11  ;;  %v656_v16 = vpack.c.bf16 (!%p569_p5), %v321_v15, %v320_v14  ;;  %v322_v17 = vld [vmem:[%s931_s3 + $0x40] sm:$0xff] (!%p569_p5)  ;;  %v323_v18 = vld [vmem:[%s931_s3 + $0x48] sm:$0xff] (!%p569_p5)  ;;  %v324_v20 = vld [vmem:[%s931_s3 + $0x50] sm:$0xff] (!%p569_p5) }
  0x1c   : > { %648 = vmatpush3.bf16.msra.mxu1 (!%p569_p5), %v647_v9  ;;  %v659_v19 = vpack.c.bf16 (!%p569_p5), %v323_v18, %v322_v17  ;;  %v325_v21 = vld [vmem:[%s931_s3 + $0x58] sm:$0xff] (!%p569_p5)  ;;  %v326_v23 = vld [vmem:[%s931_s3 + $0x60] sm:$0xff] (!%p569_p5)  ;;  %v327_v24 = vld [vmem:[%s931_s3 + $0x68] sm:$0xff] (!%p569_p5) }
  0x1d   : > { %649 = vmatprep.subr.bf16.mxu1 (!%p569_p5), %v769_v8  ;;  %v662_v22 = vpack.c.bf16 (!%p569_p5), %v325_v21, %v324_v20  ;;  %v665_v25 = vpack.c.bf16 (!%p569_p5), %v327_v24, %v326_v23  ;;  %v328_v26 = vld [vmem:[%s931_s3 + $0x70] sm:$0xff] (!%p569_p5)  ;;  %v329_v27 = vld [vmem:[%s931_s3 + $0x78] sm:$0xff] (!%p569_p5)  ;;  %v570_v29 = vld [vmem:[%s930_s2] ss:$0 sm:$0xff] (!%p569_p5) }
  0x1e   : > { %v668_v28 = vpack.c.bf16 (!%p569_p5), %v329_v27, %v328_v26 }
  0x20   : > { %651 = vmatpush3.bf16.msra.mxu1 %v650_v10 }
  0x21   : > { %652 = vmatprep.subr.bf16.mxu1 %v769_v8 }
  0x24   : > { %654 = vmatpush3.bf16.msra.mxu1 %v653_v13 }
  0x25   : > { %655 = vmatprep.subr.bf16.mxu1 %v769_v8 }
  0x28   : > { %657 = vmatpush3.bf16.msra.mxu1 %v656_v16 }
  0x29   : > { %658 = vmatprep.subr.bf16.mxu1 %v769_v8 }
  0x2c   : > { %660 = vmatpush3.bf16.msra.mxu1 %v659_v19 }
  0x2d   : > { %661 = vmatprep.subr.bf16.mxu1 %v769_v8 }
  0x30   : > { %663 = vmatpush3.bf16.msra.mxu1 %v662_v22 }
  0x31   : > { %664 = vmatprep.subr.bf16.mxu1 %v769_v8 }
  0x34   : > { %666 = vmatpush3.bf16.msra.mxu1 %v665_v25 }
  0x35   : > { %667 = vmatprep.subr.bf16.mxu1 %v769_v8 }
  0x38   : > { %669 = vmatpush3.bf16.msra.mxu1 %v668_v28 }
  0xee   : > { %v309_v30 = vpop.f32.mrb[0].mxu0 }
  0xef   : > { %v310_v31 = vadd.f32 %v570_v29, %v309_v30  ;;  %v605_v32 = vpop.f32.mrb[1].mxu0 }
  0xf1   : > { %v313_v33 = vmax.f32 %v310_v31, 0.0 }
  0xf3   : > { %639 = vmatmul.mubr.f32.vlgmr.msra.gmra.mrb[0].mxu1 %v313_v33 }
 0x1c6   : > { %v396_v34 = vpop.f32.mrb[0].mxu1 }
 0x1c7   : > { %401 = vst [vmem:[#allocation2] sm:$0xff] %v396_v34  ;;  %v640_v35 = vpop.f32.mrb[1].mxu1 }
 0x1c8 PF: > { %p572_p6 = scmp.ne.s32.totalorder %s756_s18, 1 }
 0x1c9   : > { %vm414_vm2 = vcmask (!%p572_p6), 64512   ;;  %v770_v37 = vmov (!%p572_p6), 0.0   ;;  %vm771_vm3 = vmmov (!%p572_p6), 0   ;;  %v573_v38 = vld [vmem:[%s932_s4] ss:$0 sm:$0xff] (!%p572_p6) }
 0x1ca   : > { %405 = sbr.rel (%p572_p6) target bundleno = 681 (0x2a9), region = 52  ;;  %641 = vmatprep.subr.mxu0 (!%p572_p6), %v770_v37  ;;  %643 = vmatprep.mubr.msk.f32.mxu0 (!%p572_p6), %vm771_vm3, %v770_v37 }
 0x1ce   : > { %v406_v36 = vld [vmem:[#allocation2] sm:$0xff] (!%p572_p6) }
 0x1cf   : > { %642 = vmatpush3.msra.mxu0 (!%p572_p6), %v406_v36 }
 0x1d0   : > { %644 = vmatmul.mubr.msk.f32.vlgmr.msra.gmra.mrb[0].mxu0 (!%p572_p6), %vm414_vm2, %v828_v0 }
 0x2a3   : > { %v484_v39 = vpop.f32.mrb[0].mxu0 }
 0x2a4   : > { %v485_v40 = vadd.f32 %v573_v38, %v484_v39  ;;  %v645_v41 = vpop.f32.mrb[1].mxu0 }
 0x2a6   : > { %v488_v42 = vmax.f32 %v485_v40, 0.0 }
 0x2a8   : > { %489 = vst [vmem:[#allocation3] sm:$0xff] %v488_v42 }
 0x2a9 PF: > { %p894_p7 = scmp.eq.s32.totalorder %s564_s21, 1  ;;  %s772_s26 = smov [#allocation3]  }
 0x2aa   : > { %s505_s27 = sshll.u32 %s772_s26, 4  ;;  %s506_s27 = int_to_ptr.vmem [resolvable:$true] %s505_s27 }
 0x2ab   : > { %s712_s28 = scalar_lea.vmem %s506_s27, 128  ;;  %s718_s29 = scalar_lea.vmem %s506_s27, 256 }
 0x2ac   : > { %p713_p8 = scmp.ne.s32.totalorder %s506_s27, %s712_s28  ;;  %p719_p11 = scmp.lt.s32.totalorder %s506_s27, %s506_s27 }
 0x2ad   : > { %p720_p12 = scmp.lt.s32.totalorder %s718_s29, %s712_s28 }
 0x2ae   : > { %p714_p9 = pnand %p713_p8, %p894_p7 }
 0x2af   : > { %p721_p13 = por %p720_p12, %p719_p11 }
 0x2b0   : > { %p715_p10 = pneg %p714_p9 }
 0x2b2   : > { %p722_p0 = pnand %p721_p13, %p715_p10 }
 0x2b4   : > { %725 = shalt.err (!%p722_p0)
}
 0x2b5   : > { %s726_s6 = scalar_lea.hbm %s933_s5, 128 }
 0x2b6   : > { %p727_p1 = scmp.ne.s32.totalorder %s933_s5, %s726_s6  ;;  %p732_p4 = scmp.lt.u32.totalorder %s726_s6, %s933_s5 }
 0x2b8   : > { %p728_p2 = pnand %p727_p1, %p894_p7 }
 0x2ba   : > { %p729_p3 = pneg %p728_p2 }
 0x2bc   : > { %p734_p5 = pnand %p732_p4, %p729_p3 }
 0x2be   : > { %737 = shalt.err (!%p734_p5)
}
 0x2bf   : > { %671 = dma.vmem_to_hbm [thread:$0]  (%p894_p7), %s506_s27, 128, %s933_s5, [#allocation4]  }
 0x2c0 PF: > { %p679_p6 = scmp.ge.s32.totalorder %s764_s20, 2  ;;  %p680_p8 = scmp.eq.s32.totalorder %s565_s22, 1 }
 0x2c2   : > { %p675_p9 = pnand %p680_p8, %p679_p6 }
 0x2c4   : > { %751 = dma.done.wait (!%p675_p9), [#allocation4], 128  }
 0x2c5   : > { %753 = vsyncadd (!%p675_p9), [#allocation4], 4294967168  ;;  %s18_s20 = sadd.s32 1, %s764_s20   ;;  %s935_s18 = smov %s760_s19 }
 0x2c6   : > { %p15_p10 = scmp.ge.s32.totalorder %s18_s20, 4   ;;  %s936_s19 = smov %s938_s23 }
 0x2c8   :  { %17 = sbr.rel (!%p15_p10) target bundleno = 3 (0x3), region = 86 }
 0x2cf   :  { %523 = vsyncpa [#allocation4], 1 }
 0x2d0   :  { %525 = vsyncpa [#allocation4 + $0x1], 1 }

</bundles_post_ra>
